<compile_context>
chip_gen: v7x
topology: tpu7x:2x2x1
jax: 0.10.0
libtpu: 0.0.40
codegen_flags: <defaults>
</compile_context>

<pallas_src>
import functools

import jax
import jax.numpy as jnp
from jax import lax
from jax.experimental import pallas as pl
from jax.experimental.pallas import tpu as pltpu

LN_EPS = 1e-5  # nn.LayerNorm default


def _round_up(x, m):
    return (x + m - 1) // m * m


def _vmem_step_bytes(rb, f_in, f_out, x_bytes, o_bytes):
    """Rough per-step VMEM footprint: double-buffered I/O tiles + f32 temporaries."""
    io = 2 * rb * f_in * x_bytes + 2 * rb * f_out * o_bytes
    tmp = rb * f_in * 4 + 3 * rb * f_out * 4
    return io + tmp


def ner_head_kernel(x_ref, wc_ref, g_ref, b_ref, o_ref):
    """Fused Linear(bias=False) + LayerNorm for one tile of token rows.

    x_ref : (rb, F_in)     input rows, native dtype (streamed from HBM)
    wc_ref: (F_in, F_out)  weight with columns pre-centered over out_features (resident)
    g_ref : (1, F_out)     LayerNorm gamma, f32
    b_ref : (1, F_out)     LayerNorm beta,  f32
    o_ref : (rb, F_out)    output tile (canonical layout, no wrapper transpose)
    """
    x = x_ref[...].astype(jnp.float32)
    w = wc_ref[...].astype(jnp.float32)
    # Because the weight columns were pre-centered in the wrapper,
    # yc == (x @ W) - mean(x @ W, axis=-1) up to f32 rounding, so the mean
    # reduce + subtract is not needed here.
    yc = jnp.dot(x, w, preferred_element_type=jnp.float32)      # (rb, F_out) f32
    var = jnp.mean(yc * yc, axis=-1, keepdims=True)             # biased var, like PyTorch
    inv = lax.rsqrt(var + LN_EPS)
    o_ref[...] = (yc * inv * g_ref[...] + b_ref[...]).astype(o_ref.dtype)


@functools.partial(
    jax.jit, static_argnames=("row_block", "out_dtype", "vmem_limit_bytes")
)
def ner_head(x, w, gamma, beta, *, row_block=8192, out_dtype=None,
             vmem_limit_bytes=None):
    """x: [B, S, in_features]; w: [in_features, out_features] (= PyTorch weight.T);
    gamma/beta: [out_features]. Returns [B, S, out_features] in out_dtype (default x.dtype).

    row_block: rows per grid step; sweep 4096-32768 per generation (largest on v7x)."""
    B, S, F_in = x.shape
    F_in_w, F_out = w.shape
    assert F_in_w == F_in
    rows = B * S
    out_dtype = x.dtype if out_dtype is None else out_dtype

    x_bytes = jnp.dtype(x.dtype).itemsize
    o_bytes = jnp.dtype(out_dtype).itemsize

    # ---- row tile selection (all static Python ints) -------------------------
    rb = max(8, (int(row_block) // 8) * 8)        # sublane-aligned
    rb = min(rb, _round_up(rows, 8))              # never bigger than the row count
    # Keep >= 2 grid steps when there is real work so ("parallel",) can give both
    # of v7x's TensorCores rows to chew on.
    if rows >= 2048 and pl.cdiv(rows, rb) < 2:
        rb = _round_up(pl.cdiv(rows, 2), 8)
    # Auto-shrink so double-buffered tiles + f32 intermediates fit the VMEM budget
    # (default budget fits every generation's default scoped limit).
    budget = int(0.85 * vmem_limit_bytes) if vmem_limit_bytes else 28 * 1024 * 1024
    while rb > 512 and _vmem_step_bytes(rb, F_in, F_out, x_bytes, o_bytes) > budget:
        rb = _round_up(rb // 2, 8)
    grid = pl.cdiv(rows, rb)

    # No cast, no pad: reshape is metadata-only; ragged tails are handled by
    # Pallas' OOB block masking (per-token LN keeps garbage rows isolated).
    x2 = x.reshape(rows, F_in)
    # Pre-center weight columns over out_features: x @ Wc == (x @ W) - mean(x @ W).
    wc = w - jnp.mean(w, axis=1, keepdims=True)                 # tiny (F_in, F_out) op
    g2 = gamma.reshape(1, F_out).astype(jnp.float32)
    b2 = beta.reshape(1, F_out).astype(jnp.float32)

    cost = pl.CostEstimate(
        flops=2 * rows * F_in * F_out + 6 * rows * F_out,
        transcendentals=rows,                                   # one rsqrt per token row
        bytes_accessed=int(rows * F_in * x_bytes
                           + F_in * F_out * jnp.dtype(wc.dtype).itemsize
                           + 2 * F_out * 4
                           + rows * F_out * o_bytes),
    )

    out = pl.pallas_call(
        ner_head_kernel,
        out_shape=jax.ShapeDtypeStruct((rows, F_out), out_dtype),
        grid_spec=pltpu.PrefetchScalarGridSpec(
            num_scalar_prefetch=0,
            grid=(grid,),
            in_specs=[
                pl.BlockSpec((rb, F_in), lambda i: (i, 0)),      # x rows (streamed)
                pl.BlockSpec((F_in, F_out), lambda i: (0, 0)),   # centered weight (resident)
                pl.BlockSpec((1, F_out), lambda i: (0, 0)),      # gamma
                pl.BlockSpec((1, F_out), lambda i: (0, 0)),      # beta
            ],
            out_specs=pl.BlockSpec((rb, F_out), lambda i: (i, 0)),
        ),
        compiler_params=pltpu.CompilerParams(
            dimension_semantics=("parallel",),   # row loop can split across v7x's 2 TCs
            vmem_limit_bytes=vmem_limit_bytes,   # set explicitly when sweeping large rb
        ),
        cost_estimate=cost,
    )(x2, wc, g2, b2)

    return out.reshape(B, S, F_out)


def ner_head_reference(x, w, gamma, beta):
    """Pure-JAX f32 reference matching the PyTorch module semantics."""
    y = jnp.einsum("bsf,fo->bso", x.astype(jnp.float32), w.astype(jnp.float32))
    mean = jnp.mean(y, axis=-1, keepdims=True)
    var = jnp.mean((y - mean) ** 2, axis=-1, keepdims=True)
    return (y - mean) / jnp.sqrt(var + LN_EPS) * gamma + beta


if __name__ == "__main__":
    # Small shapes consistent with the module: in_features=32, out_features=16.
    B, S, F_IN, F_OUT = 2, 8, 32, 16

    key = jax.random.PRNGKey(0)
    kx, kw = jax.random.split(key)

    x = jax.random.normal(kx, (B, S, F_IN), dtype=jnp.float32)
    # Linear weight stored as [in_features, out_features] (= PyTorch weight.T),
    # so y = x @ w matches x @ W^T.
    w = jax.random.normal(kw, (F_IN, F_OUT), dtype=jnp.float32) * (1.0 / F_IN ** 0.5)
    # nn.LayerNorm default init: weight=1, bias=0.
    gamma = jnp.ones((F_OUT,), dtype=jnp.float32)
    beta = jnp.zeros((F_OUT,), dtype=jnp.float32)

    out = jax.block_until_ready(ner_head(x, w, gamma, beta))
    assert out.shape == (B, S, F_OUT)

    ref = ner_head_reference(x, w, gamma, beta)
    # Loose enough for MXU f32 precision modes on real hardware; interpret is exact.
    assert jnp.allclose(out, ref, atol=2e-2, rtol=2e-2), "mismatch vs f32 reference"

    # Ragged-rows path: row count not a multiple of the row tile exercises the
    # no-pad / OOB-masked final block.
    x_ragged = jax.random.normal(kx, (3, 7, F_IN), dtype=jnp.float32)
    out_r = jax.block_until_ready(ner_head(x_ragged, w, gamma, beta, row_block=8))
    ref_r = ner_head_reference(x_ragged, w, gamma, beta)
    assert out_r.shape == (3, 7, F_OUT)
    assert jnp.allclose(out_r, ref_r, atol=2e-2, rtol=2e-2), "mismatch (ragged rows)"

    print("KERNEL_OK")
</pallas_src>

<mosaic_0001>
module attributes {stable_mosaic.version = 11 : i64} {
  func.func @ner_head_kernel(%arg0: i32, %arg1: memref<16x32xf32, #tpu.memory_space<vmem>>, %arg2: memref<32x16xf32, #tpu.memory_space<vmem>>, %arg3: memref<1x16xf32, #tpu.memory_space<vmem>>, %arg4: memref<1x16xf32, #tpu.memory_space<vmem>>, %arg5: memref<16x16xf32, #tpu.memory_space<vmem>>) attributes {dimension_semantics = [#tpu.dimension_semantics<parallel>], iteration_bounds = array<i64: 1>, scalar_prefetch = 0 : i64, scratch_operands = 0 : i64, tpu.core_type = #tpu.core_type<tc>, window_params = [{transform_indices = @transform_0, window_bounds = array<i64: 16, 32>}, {pipeline_mode = #tpu.pipeline_mode<synchronous>, transform_indices = @transform_1, window_bounds = array<i64: 32, 16>}, {pipeline_mode = #tpu.pipeline_mode<synchronous>, transform_indices = @transform_2, window_bounds = array<i64: 1, 16>}, {pipeline_mode = #tpu.pipeline_mode<synchronous>, transform_indices = @transform_3, window_bounds = array<i64: 1, 16>}, {transform_indices = @transform_4, window_bounds = array<i64: 16, 16>}]} {
    %c0 = arith.constant 0 : index
    %c0_0 = arith.constant 0 : index
    %0 = vector.load %arg1[%c0, %c0_0] : memref<16x32xf32, #tpu.memory_space<vmem>>, vector<16x32xf32>
    %c0_1 = arith.constant 0 : index
    %c0_2 = arith.constant 0 : index
    %1 = vector.load %arg2[%c0_1, %c0_2] : memref<32x16xf32, #tpu.memory_space<vmem>>, vector<32x16xf32>
    %cst = arith.constant dense<0.000000e+00> : vector<16x16xf32>
    %2 = tpu.matmul %0, %1, %cst {dimension_numbers = #tpu.dot_dimension_numbers<[1], [0], [0], [1], [0, 0, 1, 1], [], []>} : vector<16x32xf32>, vector<32x16xf32>, vector<16x16xf32> -> vector<16x16xf32>
    %3 = arith.mulf %2, %2 : vector<16x16xf32>
    %cst_3 = arith.constant dense<0.000000e+00> : vector<16xf32>
    %4 = vector.multi_reduction <add>, %3, %cst_3 [1] : vector<16x16xf32> to vector<16xf32>
    %5 = vector.shape_cast %4 : vector<16xf32> to vector<16x1xf32>
    %cst_4 = arith.constant 1.600000e+01 : f32
    %6 = vector.broadcast %cst_4 : f32 to vector<16x1xf32>
    %7 = arith.divf %5, %6 : vector<16x1xf32>
    %cst_5 = arith.constant 9.99999974E-6 : f32
    %8 = vector.broadcast %cst_5 : f32 to vector<16x1xf32>
    %9 = arith.addf %7, %8 : vector<16x1xf32>
    %10 = math.rsqrt %9 : vector<16x1xf32>
    %11 = vector.broadcast %10 : vector<16x1xf32> to vector<16x16xf32>
    %12 = arith.mulf %2, %11 : vector<16x16xf32>
    %c0_6 = arith.constant 0 : index
    %c0_7 = arith.constant 0 : index
    %13 = vector.load %arg3[%c0_6, %c0_7] : memref<1x16xf32, #tpu.memory_space<vmem>>, vector<1x16xf32>
    %14 = vector.broadcast %13 : vector<1x16xf32> to vector<16x16xf32>
    %15 = arith.mulf %12, %14 : vector<16x16xf32>
    %c0_8 = arith.constant 0 : index
    %c0_9 = arith.constant 0 : index
    %16 = vector.load %arg4[%c0_8, %c0_9] : memref<1x16xf32, #tpu.memory_space<vmem>>, vector<1x16xf32>
    %17 = vector.broadcast %16 : vector<1x16xf32> to vector<16x16xf32>
    %18 = arith.addf %15, %17 : vector<16x16xf32>
    %c0_10 = arith.constant 0 : index
    %c0_11 = arith.constant 0 : index
    %19 = vector.load %arg5[%c0_10, %c0_11] : memref<16x16xf32, #tpu.memory_space<vmem>>, vector<16x16xf32>
    tpu.vector_store %arg5[%c0_10, %c0_11], %18 {strides = array<i32>} : memref<16x16xf32, #tpu.memory_space<vmem>>, vector<16x16xf32>,
    return
  }
  func.func @transform_0(%arg0: i32) -> (i32, i32) {
    %c0_i32 = arith.constant 0 : i32
    %c0_i32_0 = arith.constant 0 : i32
    return %arg0, %c0_i32 : i32, i32
  }
  func.func @transform_1(%arg0: i32) -> (i32, i32) {
    %c0_i32 = arith.constant 0 : i32
    %c0_i32_0 = arith.constant 0 : i32
    %c0_i32_1 = arith.constant 0 : i32
    return %c0_i32, %c0_i32_0 : i32, i32
  }
  func.func @transform_2(%arg0: i32) -> (i32, i32) {
    %c0_i32 = arith.constant 0 : i32
    %c0_i32_0 = arith.constant 0 : i32
    %c0_i32_1 = arith.constant 0 : i32
    return %c0_i32, %c0_i32_0 : i32, i32
  }
  func.func @transform_3(%arg0: i32) -> (i32, i32) {
    %c0_i32 = arith.constant 0 : i32
    %c0_i32_0 = arith.constant 0 : i32
    %c0_i32_1 = arith.constant 0 : i32
    return %c0_i32, %c0_i32_0 : i32, i32
  }
  func.func @transform_4(%arg0: i32) -> (i32, i32) {
    %c0_i32 = arith.constant 0 : i32
    %c0_i32_0 = arith.constant 0 : i32
    return %arg0, %c0_i32 : i32, i32
  }
}

</mosaic_0001>

<bundles_post_ra>
// kernel: ner_head.1
= control target key start
LH: loop header
LB: loop body
LE: loop exit
PB: predicated region body
PF: predicated region fallthrough
CT: control target
= control target key end

     0   :  { %vm24_vm0 = vcmask 261120   ;;  %s288_s0 = inlined_call_operand.vmem [shape: f32[16,32], index: 0, kind: input, shape index: {}]   ;;  %s289_s1 = inlined_call_operand.vmem [shape: f32[32,16], index: 1, kind: input, shape index: {}]   ;;  %s290_s2 = inlined_call_operand.vmem [shape: f32[1,16], index: 2, kind: input, shape index: {}]   ;;  %s291_s3 = inlined_call_operand.vmem [shape: f32[1,16], index: 3, kind: input, shape index: {}]   ;;  %s292_s4 = inlined_call_operand.hbm [shape: f32[16,16], index: 4, kind: output, shape index: {}]  }
   0x1   :  { %v20_v0 = vld [vmem:[%s289_s1] sm:$0xff]  ;;  %v21_v1 = vld [vmem:[%s289_s1 + $0x8] sm:$0xff]  ;;  %v22_v2 = vld [vmem:[%s289_s1 + $0x10] sm:$0xff] }
   0x2   :  { %v181_v3 = vpack.c.bf16 %v21_v1, %v20_v0  ;;  %v23_v4 = vld [vmem:[%s289_s1 + $0x18] sm:$0xff]  ;;  %v18_v5 = vld [vmem:[%s288_s0] sm:$0xff] }
   0x3   :  { %v185_v6 = vpack.c.bf16 %v23_v4, %v22_v2  ;;  %178 = vmatprep.mubr.msk.f32.mxu0 %vm24_vm0, %v18_v5 }
   0x4   :  { %9 = vsyncpa [#allocation3], 0  ;;  %182 = vmatprep.subr.bf16.mxu0 %v181_v3  ;;  %v19_v7 = vld [vmem:[%s288_s0 + $0x8] sm:$0xff]  ;;  %vm108_vm1 = vcmask 130048   ;;  %v162_v21 = vld [vmem:[%s290_s2] ss:$0 sm:$0xff] }
   0x5   :  { %184 = vmatpush3.bf16.msra.mxu0 %v181_v3  ;;  %v163_v23 = vld [vmem:[%s291_s3] ss:$0 sm:$0xff]  ;;  %s220_s29 = smov [#allocation2]  }
   0x6   :  { %186 = vmatprep.subr.bf16.mxu0 %v185_v6  ;;  %s149_s30 = sshll.u32 %s220_s29, 4  ;;  %s150_s30 = int_to_ptr.vmem [resolvable:$true] %s149_s30 }
   0x7   :  { %s196_s5 = scalar_lea.vmem %s150_s30, 256  ;;  %p201_p1 = scmp.lt.s32.totalorder %s150_s30, %s150_s30 }
   0x8   :  { %p197_p0 = scmp.ne.s32.totalorder %s150_s30, %s196_s5  ;;  %p202_p2 = scmp.lt.s32.totalorder %s196_s5, %s196_s5 }
   0x9   :  { %188 = vmatpush3.bf16.msra.mxu0 %v185_v6 }
   0xa   :  { %p203_p3 = por %p202_p2, %p201_p1 }
   0xc   :  { %179 = vmatmul.mubr.msk.f32.vlgmr.msra.gmra.mrb[0].mxu0 %vm24_vm0, %v19_v7  ;;  %p204_p4 = pnand %p203_p3, %p197_p0 }
  0xdf   :  { %v180_v8 = vpop.f32.mrb[0].mxu0 }
  0xe0   :  { %v97_v9 = vpop.f32.mrb[1].mxu0  ;;  %v107_v11 = vmul.f32 %v180_v8, %v180_v8 }
  0xe1   :  { %v106_v10 = vmul.f32 %v97_v9, %v97_v9 }
  0xe2   :  { %v112_v13 = vsel %vm108_vm1, %v107_v11, 0.0 }
  0xe3   :  { %v109_v12 = vsel %vm108_vm1, %v106_v10, 0.0 }
  0xe4   :  { %110 = vadd.xlane.f32.xlu0 %v109_v12 }
  0xe8   :  { %113 = vadd.xlane.f32.xlu0 %v112_v13 }
 0x171   :  { %v111_v14 = vpop.xlane.xlu0 %110 }
 0x172   :  { %v116_v15 = vmul.f32 0.0625, %v111_v14 }
 0x174   :  { %v118_v16 = vadd.f32 1e-05, %v116_v15 }
 0x175   :  { %v114_v17 = vpop.xlane.xlu0 %113 }
 0x176   :  { %192 = vrsqrt.f32 %v118_v16  ;;  %v117_v18 = vmul.f32 0.0625, %v114_v17 }
 0x178   :  { %v119_v19 = vadd.f32 1e-05, %v117_v18 }
 0x17a   :  { %194 = vrsqrt.f32 %v119_v19 }
 0x180   :  { %v193_v20 = vpop.eup %192 }
 0x181   :  { %v122_v22 = vmul.f32 %v193_v20, %v97_v9 }
 0x183   :  { %v131_v24 = vmul.f32 %v162_v21, %v122_v22 }
 0x184   :  { %v195_v25 = vpop.eup %194 }
 0x185   :  { %v123_v26 = vmul.f32 %v195_v25, %v180_v8  ;;  %v140_v27 = vadd.f32 %v163_v23, %v131_v24 }
 0x187   :  { %v132_v28 = vmul.f32 %v162_v21, %v123_v26  ;;  %142 = vst.msk [vmem:[#allocation2] sm:$0xff] %vm108_vm1, %v140_v27 }
 0x189   :  { %v141_v29 = vadd.f32 %v163_v23, %v132_v28 }
 0x18b   :  { %143 = vst.msk [vmem:[#allocation2 + $0x8] sm:$0xff] %vm108_vm1, %v141_v29 }
 0x18c   :  { %207 = shalt.err (!%p204_p4)
}
 0x18d   :  { %s208_s6 = scalar_lea.hbm %s292_s4, 256 }
 0x18e   :  { %p209_p5 = scmp.ne.s32.totalorder %s292_s4, %s208_s6  ;;  %p212_p6 = scmp.lt.u32.totalorder %s208_s6, %s292_s4 }
 0x190   :  { %p214_p7 = pnand %p212_p6, %p209_p5 }
 0x192   :  { %217 = shalt.err (!%p214_p7)
}
 0x193   :  { %s221_s11 = smov 128   ;;  %s222_s12 = smov 8  }
 0x194   :  { %155 = dma.vmem_to_hbm [thread:$0]  %s150_s30, 256, %s292_s4, [#allocation3], %s221_s11, %s221_s11, %s222_s12  }
 0x195   :  { %218 = dma.done.wait [#allocation3], 256  }
 0x196   :  { %219 = vsyncadd [#allocation3], 4294967040 }
 0x197   :  { %159 = vsyncpa [#allocation3], 1 }

</bundles_post_ra>
